<compile_context>
chip_gen: v7x
topology: tpu7x:2x2x1
jax: 0.10.0
libtpu: 0.0.40
codegen_flags: <defaults>
</compile_context>

<pallas_src>
import functools

import jax
import jax.numpy as jnp
from jax.experimental import pallas as pl
from jax.experimental.pallas import tpu as pltpu

HID = 256          # lane-padded working width used for every layer
NUM_LAYERS = 4


def _round_up(x, m):
    return (x + m - 1) // m * m


# ------------------------------- kernel -------------------------------------
def _actor_kernel(x_ref, w_ref, b_ref, out_ref):
    """x_ref: (TB, 256) f32, w_ref: (4, 256, 256) f32/bf16 (zero padded),
    b_ref: (8, 256) f32 (rows 0..3 used), out_ref: (TB, 256) f32."""
    h = x_ref[...]                                   # f32 activations
    for layer in range(NUM_LAYERS):                  # fully unrolled; static slices are free
        w = w_ref[layer]                             # (256, 256) static slice of the slab
        h = jnp.dot(h.astype(w.dtype), w,
                    preferred_element_type=jnp.float32)   # MXU, f32 accumulation
        h = h + b_ref[layer:layer + 1, :]            # (1, 256) f32 broadcast add (VPU)
    out_ref[...] = jnp.tanh(h).astype(out_ref.dtype)  # EUP tanh, lane-dense store


# ------------------------------- wrapper ------------------------------------
@functools.partial(jax.jit, static_argnames=("action_dim", "max_batch_block"))
def actor_net_forward(x, w_slab, b_slab, action_dim, *, max_batch_block=256):
    """x: (B, state_dim) f32. w_slab: (4, 256, 256) packed weights. b_slab: (8, 256) biases."""
    B, S = x.shape
    # Batch tile: multiple of 8 (f32 sublanes), capped so double-buffered (TB, 256) f32
    # activation tiles stay far below v7x's 32 MiB scoped VMEM.
    TB = min(_round_up(max(B, 1), 8), max_batch_block)
    Bp = _round_up(B, TB)
    x_pad = jnp.zeros((Bp, HID), jnp.float32).at[:B, :S].set(x.astype(jnp.float32))

    out_pad = pl.pallas_call(
        _actor_kernel,
        out_shape=jax.ShapeDtypeStruct((Bp, HID), jnp.float32),
        grid=(Bp // TB,),
        in_specs=[
            pl.BlockSpec((TB, HID), lambda i: (i, 0), memory_space=pltpu.VMEM),
            pl.BlockSpec((NUM_LAYERS, HID, HID), lambda i: (0, 0, 0),
                         memory_space=pltpu.VMEM),          # weights stay resident
            pl.BlockSpec((8, HID), lambda i: (0, 0), memory_space=pltpu.VMEM),
        ],
        out_specs=pl.BlockSpec((TB, HID), lambda i: (i, 0), memory_space=pltpu.VMEM),
        compiler_params=pltpu.CompilerParams(
            dimension_semantics=("parallel",)),              # dual-TC sharding on v7x
    )(x_pad, w_slab, b_slab)
    return out_pad[:B, :action_dim]


# ------------------------------ params --------------------------------------
def init_params(key, state_dim, action_dim):
    """Matches the PyTorch init: weights ~ N(0, 0.1), biases ~ N(0.1, 1.0).
    Weights stored as (in, out) so each layer is x @ W + b (== x @ W_pt.T + b)."""
    ks = jax.random.split(key, 8)
    dims = [(state_dim, 256), (256, 128), (128, 64), (64, action_dim)]
    params = {}
    for i, (din, dout) in enumerate(dims, start=1):
        params[f"w{i}"] = (0.1 * jax.random.normal(ks[2 * (i - 1)], (din, dout))
                           ).astype(jnp.float32)
        params[f"b{i}"] = (0.1 + jax.random.normal(ks[2 * (i - 1) + 1], (1, dout))
                           ).astype(jnp.float32)
    return params


def pack_params(params, weight_dtype=jnp.bfloat16):
    """Pack the 4 weights into one zero-padded (4, 256, 256) slab and the 4 biases into a
    zero-padded (8, 256) slab. Padded rows/cols are exact zeros, so the padded lanes carry
    zeros through every layer and the wrapper's final slice recovers the exact result."""
    w_slab = jnp.zeros((NUM_LAYERS, HID, HID), weight_dtype)
    b_slab = jnp.zeros((8, HID), jnp.float32)
    for i in range(NUM_LAYERS):
        w = params[f"w{i + 1}"]
        b = params[f"b{i + 1}"].reshape(-1)
        din, dout = w.shape
        w_slab = w_slab.at[i, :din, :dout].set(w.astype(weight_dtype))
        b_slab = b_slab.at[i, :dout].set(b.astype(jnp.float32))
    return w_slab, b_slab


# ---------------------------- references ------------------------------------
def _reference_forward_f32(x, params):
    h = x
    for i in range(1, NUM_LAYERS + 1):
        h = h @ params[f"w{i}"] + params[f"b{i}"]
    return jnp.tanh(h)


def _reference_forward_packed(x, params, weight_dtype=jnp.bfloat16):
    """Same math as the kernel in perf mode: weights cast to weight_dtype, f32 accumulation,
    f32 bias add + tanh."""
    h = x.astype(jnp.float32)
    for i in range(1, NUM_LAYERS + 1):
        w = params[f"w{i}"].astype(weight_dtype)
        h = jnp.dot(h.astype(weight_dtype), w,
                    preferred_element_type=jnp.float32) + params[f"b{i}"]
    return jnp.tanh(h)


# -------------------------------- demo --------------------------------------
if __name__ == "__main__":
    key = jax.random.PRNGKey(0)
    k_x, k_p = jax.random.split(key)

    batch, state_dim, action_dim = 2, 16, 8
    x = jax.random.normal(k_x, (batch, state_dim), dtype=jnp.float32)
    params = init_params(k_p, state_dim, action_dim)

    # 1) Full-f32 weights: exact PyTorch semantics.
    w32, b32 = pack_params(params, weight_dtype=jnp.float32)
    out_f32 = jax.block_until_ready(actor_net_forward(x, w32, b32, action_dim))
    assert out_f32.shape == (batch, action_dim)
    ref_f32 = _reference_forward_f32(x, params)
    assert jnp.allclose(out_f32, ref_f32, atol=1e-4, rtol=1e-4)

    # 2) bf16 weight slab (perf mode: fewer MXU passes, half the weight traffic),
    #    validated against a reference that applies the identical bf16 weight cast.
    wbf, bbf = pack_params(params, weight_dtype=jnp.bfloat16)
    out_bf16 = jax.block_until_ready(actor_net_forward(x, wbf, bbf, action_dim))
    assert out_bf16.shape == (batch, action_dim)
    ref_bf16 = _reference_forward_packed(x, params, weight_dtype=jnp.bfloat16)
    assert jnp.allclose(out_bf16, ref_bf16, atol=1e-4, rtol=1e-4)

    print("KERNEL_OK")
</pallas_src>

<mosaic_0001>
module attributes {stable_mosaic.version = 11 : i64} {
  func.func @_actor_kernel(%arg0: i32, %arg1: memref<8x256xf32, #tpu.memory_space<vmem>>, %arg2: memref<4x256x256xf32, #tpu.memory_space<vmem>>, %arg3: memref<8x256xf32, #tpu.memory_space<vmem>>, %arg4: memref<8x256xf32, #tpu.memory_space<vmem>>) attributes {dimension_semantics = [#tpu.dimension_semantics<parallel>], iteration_bounds = array<i64: 1>, scalar_prefetch = 0 : i64, scratch_operands = 0 : i64, tpu.core_type = #tpu.core_type<tc>, window_params = [{transform_indices = @transform_0, window_bounds = array<i64: 8, 256>}, {pipeline_mode = #tpu.pipeline_mode<synchronous>, transform_indices = @transform_1, window_bounds = array<i64: 4, 256, 256>}, {pipeline_mode = #tpu.pipeline_mode<synchronous>, transform_indices = @transform_2, window_bounds = array<i64: 8, 256>}, {transform_indices = @transform_3, window_bounds = array<i64: 8, 256>}]} {
    %c0 = arith.constant 0 : index
    %c0_0 = arith.constant 0 : index
    %0 = vector.load %arg1[%c0, %c0_0] : memref<8x256xf32, #tpu.memory_space<vmem>>, vector<8x256xf32>
    %c0_1 = arith.constant 0 : index
    %c0_2 = arith.constant 0 : index
    %c0_3 = arith.constant 0 : index
    %1 = vector.load %arg2[%c0_1, %c0_2, %c0_3] : memref<4x256x256xf32, #tpu.memory_space<vmem>>, vector<1x256x256xf32>
    %2 = vector.shape_cast %1 : vector<1x256x256xf32> to vector<256x256xf32>
    %cst = arith.constant dense<0.000000e+00> : vector<8x256xf32>
    %3 = tpu.matmul %0, %2, %cst {dimension_numbers = #tpu.dot_dimension_numbers<[1], [0], [0], [1], [0, 0, 1, 1], [], []>} : vector<8x256xf32>, vector<256x256xf32>, vector<8x256xf32> -> vector<8x256xf32>
    %c0_4 = arith.constant 0 : index
    %c0_5 = arith.constant 0 : index
    %4 = vector.load %arg3[%c0_4, %c0_5] : memref<8x256xf32, #tpu.memory_space<vmem>>, vector<1x256xf32>
    %5 = vector.broadcast %4 : vector<1x256xf32> to vector<8x256xf32>
    %6 = arith.addf %3, %5 : vector<8x256xf32>
    %c1 = arith.constant 1 : index
    %c0_6 = arith.constant 0 : index
    %c0_7 = arith.constant 0 : index
    %7 = vector.load %arg2[%c1, %c0_6, %c0_7] : memref<4x256x256xf32, #tpu.memory_space<vmem>>, vector<1x256x256xf32>
    %8 = vector.shape_cast %7 : vector<1x256x256xf32> to vector<256x256xf32>
    %cst_8 = arith.constant dense<0.000000e+00> : vector<8x256xf32>
    %9 = tpu.matmul %6, %8, %cst_8 {dimension_numbers = #tpu.dot_dimension_numbers<[1], [0], [0], [1], [0, 0, 1, 1], [], []>} : vector<8x256xf32>, vector<256x256xf32>, vector<8x256xf32> -> vector<8x256xf32>
    %c1_9 = arith.constant 1 : index
    %c0_10 = arith.constant 0 : index
    %10 = vector.load %arg3[%c1_9, %c0_10] : memref<8x256xf32, #tpu.memory_space<vmem>>, vector<1x256xf32>
    %11 = vector.broadcast %10 : vector<1x256xf32> to vector<8x256xf32>
    %12 = arith.addf %9, %11 : vector<8x256xf32>
    %c2 = arith.constant 2 : index
    %c0_11 = arith.constant 0 : index
    %c0_12 = arith.constant 0 : index
    %13 = vector.load %arg2[%c2, %c0_11, %c0_12] : memref<4x256x256xf32, #tpu.memory_space<vmem>>, vector<1x256x256xf32>
    %14 = vector.shape_cast %13 : vector<1x256x256xf32> to vector<256x256xf32>
    %cst_13 = arith.constant dense<0.000000e+00> : vector<8x256xf32>
    %15 = tpu.matmul %12, %14, %cst_13 {dimension_numbers = #tpu.dot_dimension_numbers<[1], [0], [0], [1], [0, 0, 1, 1], [], []>} : vector<8x256xf32>, vector<256x256xf32>, vector<8x256xf32> -> vector<8x256xf32>
    %c2_14 = arith.constant 2 : index
    %c0_15 = arith.constant 0 : index
    %16 = vector.load %arg3[%c2_14, %c0_15] : memref<8x256xf32, #tpu.memory_space<vmem>>, vector<1x256xf32>
    %17 = vector.broadcast %16 : vector<1x256xf32> to vector<8x256xf32>
    %18 = arith.addf %15, %17 : vector<8x256xf32>
    %c3 = arith.constant 3 : index
    %c0_16 = arith.constant 0 : index
    %c0_17 = arith.constant 0 : index
    %19 = vector.load %arg2[%c3, %c0_16, %c0_17] : memref<4x256x256xf32, #tpu.memory_space<vmem>>, vector<1x256x256xf32>
    %20 = vector.shape_cast %19 : vector<1x256x256xf32> to vector<256x256xf32>
    %cst_18 = arith.constant dense<0.000000e+00> : vector<8x256xf32>
    %21 = tpu.matmul %18, %20, %cst_18 {dimension_numbers = #tpu.dot_dimension_numbers<[1], [0], [0], [1], [0, 0, 1, 1], [], []>} : vector<8x256xf32>, vector<256x256xf32>, vector<8x256xf32> -> vector<8x256xf32>
    %c3_19 = arith.constant 3 : index
    %c0_20 = arith.constant 0 : index
    %22 = vector.load %arg3[%c3_19, %c0_20] : memref<8x256xf32, #tpu.memory_space<vmem>>, vector<1x256xf32>
    %23 = vector.broadcast %22 : vector<1x256xf32> to vector<8x256xf32>
    %24 = arith.addf %21, %23 : vector<8x256xf32>
    %25 = math.tanh %24 : vector<8x256xf32>
    %c0_21 = arith.constant 0 : index
    %c0_22 = arith.constant 0 : index
    %26 = vector.load %arg4[%c0_21, %c0_22] : memref<8x256xf32, #tpu.memory_space<vmem>>, vector<8x256xf32>
    tpu.vector_store %arg4[%c0_21, %c0_22], %25 {strides = array<i32>} : memref<8x256xf32, #tpu.memory_space<vmem>>, vector<8x256xf32>,
    return
  }
  func.func @transform_0(%arg0: i32) -> (i32, i32) {
    %c0_i32 = arith.constant 0 : i32
    %c0_i32_0 = arith.constant 0 : i32
    return %arg0, %c0_i32 : i32, i32
  }
  func.func @transform_1(%arg0: i32) -> (i32, i32, i32) {
    %c0_i32 = arith.constant 0 : i32
    %c0_i32_0 = arith.constant 0 : i32
    %c0_i32_1 = arith.constant 0 : i32
    %c0_i32_2 = arith.constant 0 : i32
    return %c0_i32, %c0_i32_0, %c0_i32_1 : i32, i32, i32
  }
  func.func @transform_2(%arg0: i32) -> (i32, i32) {
    %c0_i32 = arith.constant 0 : i32
    %c0_i32_0 = arith.constant 0 : i32
    %c0_i32_1 = arith.constant 0 : i32
    return %c0_i32, %c0_i32_0 : i32, i32
  }
  func.func @transform_3(%arg0: i32) -> (i32, i32) {
    %c0_i32 = arith.constant 0 : i32
    %c0_i32_0 = arith.constant 0 : i32
    return %arg0, %c0_i32 : i32, i32
  }
}

</mosaic_0001>

<bundles_post_ra>
// kernel: actor_net_forward.1
= control target key start
LH: loop header
LB: loop body
LE: loop exit
PB: predicated region body
PF: predicated region fallthrough
CT: control target
= control target key end

     0   :  { %8 = vsyncpa [#allocation3], 0  ;;  %s923_s12 = smov [#allocation2]   ;;  %s994_s0 = inlined_call_operand.vmem [shape: f32[8,256], index: 0, kind: input, shape index: {}]   ;;  %s995_s1 = inlined_call_operand.hbm [shape: f32[4,256,256], index: 1, kind: input, shape index: {}]   ;;  %s996_s2 = inlined_call_operand.vmem [shape: f32[8,256], index: 2, kind: input, shape index: {}]   ;;  %s997_s3 = inlined_call_operand.vmem [shape: f32[8,256], index: 3, kind: output, shape index: {}]  }
   0x1   :  { %s16_s13 = sshll.u32 %s923_s12, 4  ;;  %s899_s16 = scalar_lea.hbm %s995_s1, 32768  ;;  %s17_s13 = int_to_ptr.vmem [resolvable:$true] %s16_s13 }
   0x2   :  { %p900_p0 = scmp.ne.s32.totalorder %s995_s1, %s899_s16  ;;  %p903_p1 = scmp.lt.u32.totalorder %s899_s16, %s995_s1 }
   0x4   :  { %p905_p2 = pnand %p903_p1, %p900_p0 }
   0x6   :  { %908 = shalt.err (!%p905_p2)
}
   0x7   :  { %s909_s21 = scalar_lea.vmem %s17_s13, 32768  ;;  %p914_p4 = scmp.lt.s32.totalorder %s17_s13, %s17_s13 }
   0x8   :  { %p910_p3 = scmp.ne.s32.totalorder %s17_s13, %s909_s21  ;;  %p915_p5 = scmp.lt.s32.totalorder %s909_s21, %s909_s21 }
   0xa   :  { %p916_p6 = por %p915_p5, %p914_p4 }
   0xc   :  { %p917_p7 = pnand %p916_p6, %p910_p3 }
   0xe   :  { %920 = shalt.err (!%p917_p7)
}
   0xf   :  { %s924_s22 = smov 256   ;;  %s925_s23 = smov 16  }
  0x10   :  { %22 = dma.hbm_to_vmem [thread:$0]  %s995_s1, 32768, %s17_s13, [#allocation3], %s924_s22, %s924_s22, %s925_s23  }
  0x11   :  { %921 = dma.done.wait [#allocation3], 32768  }
  0x12   :  { %922 = vsyncadd [#allocation3], 4294934528  ;;  %v31_v0 = vld [vmem:[#allocation2 + $0x8] sm:$0xff]  ;;  %v33_v1 = vld [vmem:[#allocation2 + $0x18] sm:$0xff] }
  0x13   :  { %v30_v2 = vld [vmem:[#allocation2] sm:$0xff]  ;;  %v636_v3 = vpack.c.bf16 %v33_v1, %v31_v0  ;;  %v32_v4 = vld [vmem:[#allocation2 + $0x10] sm:$0xff]  ;;  %v35_v5 = vld [vmem:[#allocation2 + $0x28] sm:$0xff] }
  0x14   :  { %v37_v6 = vld [vmem:[#allocation2 + $0x38] sm:$0xff]  ;;  %v638_v7 = vpack.c.bf16 %v32_v4, %v30_v2  ;;  %v34_v9 = vld [vmem:[#allocation2 + $0x20] sm:$0xff]  ;;  %v36_v10 = vld [vmem:[#allocation2 + $0x30] sm:$0xff] }
  0x15   :  { %v640_v8 = vpack.c.bf16 %v37_v6, %v35_v5  ;;  %v39_v11 = vld [vmem:[#allocation2 + $0x48] sm:$0xff]  ;;  %637 = vmatprep.subr.bf16.mxu0 %v636_v3  ;;  %v41_v12 = vld [vmem:[#allocation2 + $0x58] sm:$0xff]  ;;  %v642_v13 = vpack.c.bf16 %v36_v10, %v34_v9  ;;  %v38_v15 = vld [vmem:[#allocation2 + $0x40] sm:$0xff] }
  0x16   :  { %639 = vmatpush1.bf16.msra.mxu0 %v638_v7  ;;  %v644_v14 = vpack.c.bf16 %v41_v12, %v39_v11  ;;  %v40_v16 = vld [vmem:[#allocation2 + $0x50] sm:$0xff]  ;;  %v43_v17 = vld [vmem:[#allocation2 + $0x68] sm:$0xff]  ;;  %v45_v18 = vld [vmem:[#allocation2 + $0x78] sm:$0xff] }
  0x17   :  { %641 = vmatprep.subr.bf16.mxu0 %v640_v8  ;;  %v646_v19 = vpack.c.bf16 %v40_v16, %v38_v15  ;;  %v648_v20 = vpack.c.bf16 %v45_v18, %v43_v17  ;;  %v42_v21 = vld [vmem:[#allocation2 + $0x60] sm:$0xff]  ;;  %v44_v22 = vld [vmem:[#allocation2 + $0x70] sm:$0xff]  ;;  %v47_v23 = vld [vmem:[#allocation2 + $0x88] sm:$0xff] }
  0x18   :  { %v49_v24 = vld [vmem:[#allocation2 + $0x98] sm:$0xff]  ;;  %v650_v25 = vpack.c.bf16 %v44_v22, %v42_v21  ;;  %v46_v27 = vld [vmem:[#allocation2 + $0x80] sm:$0xff]  ;;  %v48_v28 = vld [vmem:[#allocation2 + $0x90] sm:$0xff] }
  0x19   :  { %v652_v26 = vpack.c.bf16 %v49_v24, %v47_v23  ;;  %v51_v29 = vld [vmem:[#allocation2 + $0xa8] sm:$0xff]  ;;  %v53_v30 = vld [vmem:[#allocation2 + $0xb8] sm:$0xff]  ;;  %v654_v31 = vpack.c.bf16 %v48_v28, %v46_v27  ;;  %v50_v33 = vld [vmem:[#allocation2 + $0xa0] sm:$0xff] }
  0x1a   :  { %643 = vmatpush1.bf16.msra.mxu0 %v642_v13  ;;  %v656_v32 = vpack.c.bf16 %v53_v30, %v51_v29  ;;  %v52_v34 = vld [vmem:[#allocation2 + $0xb0] sm:$0xff]  ;;  %v55_v35 = vld [vmem:[#allocation2 + $0xc8] sm:$0xff]  ;;  %v57_v36 = vld [vmem:[#allocation2 + $0xd8] sm:$0xff] }
  0x1b   :  { %645 = vmatprep.subr.bf16.mxu0 %v644_v14  ;;  %v658_v37 = vpack.c.bf16 %v52_v34, %v50_v33  ;;  %v54_v38 = vld [vmem:[#allocation2 + $0xc0] sm:$0xff]  ;;  %v56_v39 = vld [vmem:[#allocation2 + $0xd0] sm:$0xff]  ;;  %v660_v40 = vpack.c.bf16 %v57_v36, %v55_v35  ;;  %v59_v41 = vld [vmem:[#allocation2 + $0xe8] sm:$0xff] }
  0x1c   :  { %v61_v42 = vld [vmem:[#allocation2 + $0xf8] sm:$0xff]  ;;  %v179_v44 = vld [vmem:[#allocation2 + $0x208] sm:$0xff]  ;;  %v178_v46 = vld [vmem:[#allocation2 + $0x200] sm:$0xff]  ;;  %v662_v51 = vpack.c.bf16 %v56_v39, %v54_v38 }
  0x1d   :  { %v29_v43 = vld [vmem:[%s994_s0 + $0x8] sm:$0xff]  ;;  %v180_v48 = vld [vmem:[#allocation2 + $0x210] sm:$0xff]  ;;  %v183_v49 = vld [vmem:[#allocation2 + $0x228] sm:$0xff]  ;;  %v664_v57 = vpack.c.bf16 %v61_v42, %v59_v41 }
  0x1e   :  { %647 = vmatpush1.bf16.msra.mxu0 %v646_v19  ;;  %170 = vmatprep.mubr.f32.mxu0 %v29_v43  ;;  %v181_v45 = vld [vmem:[#allocation2 + $0x218] sm:$0xff]  ;;  %v702_v52 = vpack.c.bf16 %v180_v48, %v178_v46  ;;  %v182_v54 = vld [vmem:[#allocation2 + $0x220] sm:$0xff]  ;;  %v184_v55 = vld [vmem:[#allocation2 + $0x230] sm:$0xff] }
  0x1f   :  { %649 = vmatprep.subr.bf16.mxu0 %v648_v20  ;;  %v700_v47 = vpack.c.bf16 %v181_v45, %v179_v44  ;;  %v185_v50 = vld [vmem:[#allocation2 + $0x238] sm:$0xff]  ;;  %v187_v56 = vld [vmem:[#allocation2 + $0x248] sm:$0xff]  ;;  %v58_v58 = vld [vmem:[#allocation2 + $0xe0] sm:$0xff]  ;;  %v706_v63 = vpack.c.bf16 %v184_v55, %v182_v54 }
  0x20   :  { %v704_v53 = vpack.c.bf16 %v185_v50, %v183_v49  ;;  %v60_v59 = vld [vmem:[#allocation2 + $0xf0] sm:$0xff]  ;;  %v189_v60 = vld [vmem:[#allocation2 + $0x258] sm:$0xff]  ;;  %v63_v61 = vld [vmem:[#allocation2 + $0x108] sm:$0xff] }
  0x21   :  { %701 = vmatprep.subr.bf16.mxu1 %v700_v47  ;;  %v65_v62 = vld [vmem:[#allocation2 + $0x118] sm:$0xff]  ;;  %v708_v0 = vpack.c.bf16 %v189_v60, %v187_v56  ;;  %v186_v1 = vld [vmem:[#allocation2 + $0x240] sm:$0xff]  ;;  %v188_v2 = vld [vmem:[#allocation2 + $0x250] sm:$0xff]  ;;  %v666_v3 = vpack.c.bf16 %v60_v59, %v58_v58 }
  0x22   :  { %651 = vmatpush1.bf16.msra.mxu0 %v650_v25  ;;  %703 = vmatpush1.bf16.msra.mxu1 %v702_v52  ;;  %v191_v4 = vld [vmem:[#allocation2 + $0x268] sm:$0xff]  ;;  %v193_v5 = vld [vmem:[#allocation2 + $0x278] sm:$0xff]  ;;  %v668_v6 = vpack.c.bf16 %v65_v62, %v63_v61  ;;  %v62_v7 = vld [vmem:[#allocation2 + $0x100] sm:$0xff]  ;;  %v710_v11 = vpack.c.bf16 %v188_v2, %v186_v1 }
  0x23   :  { %653 = vmatprep.subr.bf16.mxu0 %v652_v26  ;;  %705 = vmatprep.subr.bf16.mxu1 %v704_v53  ;;  %v64_v8 = vld [vmem:[#allocation2 + $0x110] sm:$0xff]  ;;  %v67_v9 = vld [vmem:[#allocation2 + $0x128] sm:$0xff]  ;;  %v69_v10 = vld [vmem:[#allocation2 + $0x138] sm:$0xff]  ;;  %v712_v12 = vpack.c.bf16 %v193_v5, %v191_v4 }
  0x24   :  { %v190_v13 = vld [vmem:[#allocation2 + $0x260] sm:$0xff]  ;;  %v192_v14 = vld [vmem:[#allocation2 + $0x270] sm:$0xff]  ;;  %v670_v15 = vpack.c.bf16 %v64_v8, %v62_v7  ;;  %v195_v16 = vld [vmem:[#allocation2 + $0x288] sm:$0xff]  ;;  %v672_v18 = vpack.c.bf16 %v69_v10, %v67_v9 }
  0x25   :  { %v197_v17 = vld [vmem:[#allocation2 + $0x298] sm:$0xff]  ;;  %v66_v19 = vld [vmem:[#allocation2 + $0x120] sm:$0xff]  ;;  %v68_v20 = vld [vmem:[#allocation2 + $0x130] sm:$0xff]  ;;  %v714_v23 = vpack.c.bf16 %v192_v14, %v190_v13 }
  0x26   :  { %655 = vmatpush1.bf16.msra.mxu0 %v654_v31  ;;  %707 = vmatpush1.bf16.msra.mxu1 %v706_v63  ;;  %v71_v21 = vld [vmem:[#allocation2 + $0x148] sm:$0xff]  ;;  %v73_v22 = vld [vmem:[#allocation2 + $0x158] sm:$0xff]  ;;  %v716_v24 = vpack.c.bf16 %v197_v17, %v195_v16  ;;  %v194_v25 = vld [vmem:[#allocation2 + $0x280] sm:$0xff]  ;;  %v674_v27 = vpack.c.bf16 %v68_v20, %v66_v19 }
  0x27   :  { %657 = vmatprep.subr.bf16.mxu0 %v656_v32  ;;  %709 = vmatprep.subr.bf16.mxu1 %v708_v0  ;;  %v196_v26 = vld [vmem:[#allocation2 + $0x290] sm:$0xff]  ;;  %v199_v28 = vld [vmem:[#allocation2 + $0x2a8] sm:$0xff]  ;;  %v201_v29 = vld [vmem:[#allocation2 + $0x2b8] sm:$0xff]  ;;  %v676_v30 = vpack.c.bf16 %v73_v22, %v71_v21 }
  0x28   :  { %v70_v31 = vld [vmem:[#allocation2 + $0x140] sm:$0xff]  ;;  %v72_v32 = vld [vmem:[#allocation2 + $0x150] sm:$0xff]  ;;  %v75_v33 = vld [vmem:[#allocation2 + $0x168] sm:$0xff]  ;;  %v718_v35 = vpack.c.bf16 %v196_v26, %v194_v25  ;;  %v720_v36 = vpack.c.bf16 %v201_v29, %v199_v28 }
  0x29   :  { %v77_v34 = vld [vmem:[#allocation2 + $0x178] sm:$0xff]  ;;  %v200_v38 = vld [vmem:[#allocation2 + $0x2b0] sm:$0xff]  ;;  %v678_v39 = vpack.c.bf16 %v72_v32, %v70_v31  ;;  %v74_v43 = vld [vmem:[#allocation2 + $0x160] sm:$0xff] }
  0x2a   :  { %659 = vmatpush1.bf16.msra.mxu0 %v658_v37  ;;  %711 = vmatpush1.bf16.msra.mxu1 %v710_v11  ;;  %v198_v37 = vld [vmem:[#allocation2 + $0x2a0] sm:$0xff]  ;;  %v205_v41 = vld [vmem:[#allocation2 + $0x2d8] sm:$0xff]  ;;  %v680_v42 = vpack.c.bf16 %v77_v34, %v75_v33  ;;  %v76_v44 = vld [vmem:[#allocation2 + $0x170] sm:$0xff] }
  0x2b   :  { %661 = vmatprep.subr.bf16.mxu0 %v660_v40  ;;  %713 = vmatprep.subr.bf16.mxu1 %v712_v12  ;;  %v203_v40 = vld [vmem:[#allocation2 + $0x2c8] sm:$0xff]  ;;  %v81_v46 = vld [vmem:[#allocation2 + $0x198] sm:$0xff]  ;;  %v722_v47 = vpack.c.bf16 %v200_v38, %v198_v37  ;;  %v202_v49 = vld [vmem:[#allocation2 + $0x2c0] sm:$0xff] }
  0x2c   :  { %v79_v45 = vld [vmem:[#allocation2 + $0x188] sm:$0xff]  ;;  %v724_v48 = vpack.c.bf16 %v205_v41, %v203_v40  ;;  %v204_v50 = vld [vmem:[#allocation2 + $0x2d0] sm:$0xff]  ;;  %v209_v53 = vld [vmem:[#allocation2 + $0x2f8] sm:$0xff] }
  0x2d   :  { %v207_v52 = vld [vmem:[#allocation2 + $0x2e8] sm:$0xff]  ;;  %v684_v54 = vpack.c.bf16 %v81_v46, %v79_v45  ;;  %v78_v55 = vld [vmem:[#allocation2 + $0x180] sm:$0xff]  ;;  %v80_v56 = vld [vmem:[#allocation2 + $0x190] sm:$0xff]  ;;  %v726_v59 = vpack.c.bf16 %v204_v50, %v202_v49 }
  0x2e   :  { %663 = vmatpush1.bf16.msra.mxu0 %v662_v51  ;;  %715 = vmatpush1.bf16.msra.mxu1 %v714_v23  ;;  %v682_v51 = vpack.c.bf16 %v76_v44, %v74_v43  ;;  %v85_v58 = vld [vmem:[#allocation2 + $0x1b8] sm:$0xff]  ;;  %v728_v60 = vpack.c.bf16 %v209_v53, %v207_v52  ;;  %v206_v61 = vld [vmem:[#allocation2 + $0x2e0] sm:$0xff]  ;;  %v208_v62 = vld [vmem:[#allocation2 + $0x2f0] sm:$0xff]  ;;  %v686_v63 = vpack.c.bf16 %v80_v56, %v78_v55 }
  0x2f   :  { %665 = vmatprep.subr.bf16.mxu0 %v664_v57  ;;  %717 = vmatprep.subr.bf16.mxu1 %v716_v24  ;;  %v83_v57 = vld [vmem:[#allocation2 + $0x1a8] sm:$0xff]  ;;  %v213_v1 = vld [vmem:[#allocation2 + $0x318] sm:$0xff]  ;;  %v84_v4 = vld [vmem:[#allocation2 + $0x1b0] sm:$0xff]  ;;  %v730_v7 = vpack.c.bf16 %v208_v62, %v206_v61 }
  0x30   :  { %v211_v0 = vld [vmem:[#allocation2 + $0x308] sm:$0xff]  ;;  %v688_v2 = vpack.c.bf16 %v85_v58, %v83_v57  ;;  %v210_v9 = vld [vmem:[#allocation2 + $0x300] sm:$0xff]  ;;  %v212_v10 = vld [vmem:[#allocation2 + $0x310] sm:$0xff] }
  0x31   :  { %v87_v5 = vld [vmem:[#allocation2 + $0x1c8] sm:$0xff]  ;;  %v732_v8 = vpack.c.bf16 %v213_v1, %v211_v0  ;;  %v217_v13 = vld [vmem:[#allocation2 + $0x338] sm:$0xff]  ;;  %v88_v16 = vld [vmem:[#allocation2 + $0x1d0] sm:$0xff]  ;;  %v734_v19 = vpack.c.bf16 %v212_v10, %v210_v9 }
  0x32   :  { %667 = vmatpush1.bf16.msra.mxu0 %v666_v3  ;;  %719 = vmatpush1.bf16.msra.mxu1 %v718_v35  ;;  %v82_v3 = vld [vmem:[#allocation2 + $0x1a0] sm:$0xff]  ;;  %v215_v12 = vld [vmem:[#allocation2 + $0x328] sm:$0xff]  ;;  %v216_v22 = vld [vmem:[#allocation2 + $0x330] sm:$0xff] }
  0x33   :  { %669 = vmatprep.subr.bf16.mxu0 %v668_v6  ;;  %721 = vmatprep.subr.bf16.mxu1 %v720_v36  ;;  %v89_v6 = vld [vmem:[#allocation2 + $0x1d8] sm:$0xff]  ;;  %v690_v11 = vpack.c.bf16 %v84_v4, %v82_v3  ;;  %v91_v17 = vld [vmem:[#allocation2 + $0x1e8] sm:$0xff]  ;;  %v736_v20 = vpack.c.bf16 %v217_v13, %v215_v12  ;;  %v214_v21 = vld [vmem:[#allocation2 + $0x320] sm:$0xff] }
  0x34   :  { %v692_v14 = vpack.c.bf16 %v89_v6, %v87_v5  ;;  %v219_v24 = vld [vmem:[#allocation2 + $0x348] sm:$0xff]  ;;  %v221_v25 = vld [vmem:[#allocation2 + $0x358] sm:$0xff]  ;;  %v92_v28 = vld [vmem:[#allocation2 + $0x1f0] sm:$0xff]  ;;  %v738_v29 = vpack.c.bf16 %v216_v22, %v214_v21 }
  0x35   :  { %v218_v31 = vld [vmem:[#allocation2 + $0x340] sm:$0xff]  ;;  %v220_v32 = vld [vmem:[#allocation2 + $0x350] sm:$0xff]  ;;  %v223_v34 = vld [vmem:[#allocation2 + $0x368] sm:$0xff] }
  0x36   :  { %671 = vmatpush1.bf16.msra.mxu0 %v670_v15  ;;  %723 = vmatpush1.bf16.msra.mxu1 %v722_v47  ;;  %v86_v15 = vld [vmem:[#allocation2 + $0x1c0] sm:$0xff]  ;;  %v225_v35 = vld [vmem:[#allocation2 + $0x378] sm:$0xff]  ;;  %v742_v36 = vpack.c.bf16 %v220_v32, %v218_v31  ;;  %v28_v40 = vld [vmem:[%s994_s0] sm:$0xff] }
  0x37   :  { %673 = vmatprep.subr.bf16.mxu0 %v672_v18  ;;  %725 = vmatprep.subr.bf16.mxu1 %v724_v48  ;;  %v93_v18 = vld [vmem:[#allocation2 + $0x1f8] sm:$0xff]  ;;  %v694_v23 = vpack.c.bf16 %v88_v16, %v86_v15  ;;  %v744_v37 = vpack.c.bf16 %v225_v35, %v223_v34  ;;  %v222_v38 = vld [vmem:[#allocation2 + $0x360] sm:$0xff]  ;;  %v227_v41 = vld [vmem:[#allocation2 + $0x388] sm:$0xff] }
  0x38   :  { %v696_v26 = vpack.c.bf16 %v93_v18, %v91_v17  ;;  %v226_v45 = vld [vmem:[#allocation2 + $0x380] sm:$0xff]  ;;  %v228_v46 = vld [vmem:[#allocation2 + $0x390] sm:$0xff]  ;;  %v231_v47 = vld [vmem:[#allocation2 + $0x3a8] sm:$0xff] }
  0x39   :  { %v233_v48 = vld [vmem:[#allocation2 + $0x3b8] sm:$0xff]  ;;  %v750_v49 = vpack.c.bf16 %v228_v46, %v226_v45  ;;  %v232_v52 = vld [vmem:[#allocation2 + $0x3b0] sm:$0xff]  ;;  %v235_v53 = vld [vmem:[#allocation2 + $0x3c8] sm:$0xff] }
  0x3a   :  { %675 = vmatpush1.bf16.msra.mxu0 %v674_v27  ;;  %727 = vmatpush1.bf16.msra.mxu1 %v726_v59  ;;  %v90_v27 = vld [vmem:[#allocation2 + $0x1e0] sm:$0xff]  ;;  %v752_v50 = vpack.c.bf16 %v233_v48, %v231_v47  ;;  %v236_v58 = vld [vmem:[#allocation2 + $0x3d0] sm:$0xff]  ;;  %v241_v61 = vld [vmem:[#allocation2 + $0x3f8] sm:$0xff] }
  0x3b   :  { %677 = vmatprep.subr.bf16.mxu0 %v676_v30  ;;  %729 = vmatprep.subr.bf16.mxu1 %v728_v60  ;;  %v740_v30 = vpack.c.bf16 %v221_v25, %v219_v24  ;;  %v698_v33 = vpack.c.bf16 %v92_v28, %v90_v27  ;;  %v234_v57 = vld [vmem:[#allocation2 + $0x3c0] sm:$0xff]  ;;  %v239_v60 = vld [vmem:[#allocation2 + $0x3e8] sm:$0xff]  ;;  %v240_v0 = vld [vmem:[#allocation2 + $0x3f0] sm:$0xff] }
  0x3c   :  { %v758_v59 = vpack.c.bf16 %v236_v58, %v234_v57  ;;  %v760_v62 = vpack.c.bf16 %v241_v61, %v239_v60  ;;  %v330_v3 = vld [vmem:[#allocation2 + $0x418] sm:$0xff]  ;;  %v327_v4 = vld [vmem:[#allocation2 + $0x400] sm:$0xff]  ;;  %v329_v6 = vld [vmem:[#allocation2 + $0x410] sm:$0xff] }
  0x3d   :  { %v766_v9 = vpack.c.bf16 %v329_v6, %v327_v4  ;;  %v333_v12 = vld [vmem:[#allocation2 + $0x430] sm:$0xff]  ;;  %v336_v13 = vld [vmem:[#allocation2 + $0x448] sm:$0xff]  ;;  %v335_v17 = vld [vmem:[#allocation2 + $0x440] sm:$0xff] }
  0x3e   :  { %679 = vmatpush1.bf16.msra.mxu0 %v678_v39  ;;  %731 = vmatpush1.bf16.msra.mxu1 %v730_v7  ;;  %v224_v39 = vld [vmem:[#allocation2 + $0x370] sm:$0xff]  ;;  %v332_v7 = vld [vmem:[#allocation2 + $0x428] sm:$0xff]  ;;  %v350_v32 = vld [vmem:[#allocation2 + $0x4b8] sm:$0xff] }
  0x3f   :  { %681 = vmatprep.subr.bf16.mxu0 %v680_v42  ;;  %733 = vmatprep.subr.bf16.mxu1 %v732_v8  ;;  %v229_v42 = vld [vmem:[#allocation2 + $0x398] sm:$0xff]  ;;  %v746_v43 = vpack.c.bf16 %v224_v39, %v222_v38  ;;  %v337_v18 = vld [vmem:[#allocation2 + $0x450] sm:$0xff]  ;;  %v344_v25 = vld [vmem:[#allocation2 + $0x488] sm:$0xff] }
  0x40   :  { %v748_v44 = vpack.c.bf16 %v229_v42, %v227_v41  ;;  %v334_v8 = vld [vmem:[#allocation2 + $0x438] sm:$0xff]  ;;  %v774_v21 = vpack.c.bf16 %v337_v18, %v335_v17  ;;  %v341_v24 = vld [vmem:[#allocation2 + $0x470] sm:$0xff]  ;;  %v348_v31 = vld [vmem:[#allocation2 + $0x4a8] sm:$0xff] }
  0x41   :  { %v768_v10 = vpack.c.bf16 %v334_v8, %v332_v7  ;;  %v784_v34 = vpack.c.bf16 %v350_v32, %v348_v31  ;;  %v347_v35 = vld [vmem:[#allocation2 + $0x4a0] sm:$0xff]  ;;  %v354_v38 = vld [vmem:[#allocation2 + $0x4d8] sm:$0xff]  ;;  %v353_v42 = vld [vmem:[#allocation2 + $0x4d0] sm:$0xff] }
  0x42   :  { %683 = vmatpush1.bf16.msra.mxu0 %v682_v51  ;;  %735 = vmatpush1.bf16.msra.mxu1 %v734_v19  ;;  %v230_v51 = vld [vmem:[#allocation2 + $0x3a0] sm:$0xff]  ;;  %v340_v19 = vld [vmem:[#allocation2 + $0x468] sm:$0xff]  ;;  %v357_v48 = vld [vmem:[#allocation2 + $0x4f0] sm:$0xff] }
  0x43   :  { %685 = vmatprep.subr.bf16.mxu0 %v684_v54  ;;  %737 = vmatprep.subr.bf16.mxu1 %v736_v20  ;;  %v237_v54 = vld [vmem:[#allocation2 + $0x3d8] sm:$0xff]  ;;  %v754_v55 = vpack.c.bf16 %v232_v52, %v230_v51  ;;  %v351_v41 = vld [vmem:[#allocation2 + $0x4c0] sm:$0xff]  ;;  %v365_v60 = vld [vmem:[#allocation2 + $0x530] sm:$0xff] }
  0x44   :  { %v756_v56 = vpack.c.bf16 %v237_v54, %v235_v53  ;;  %v342_v20 = vld [vmem:[#allocation2 + $0x478] sm:$0xff]  ;;  %v790_v45 = vpack.c.bf16 %v353_v42, %v351_v41  ;;  %v355_v47 = vld [vmem:[#allocation2 + $0x4e0] sm:$0xff]  ;;  %v361_v54 = vld [vmem:[#allocation2 + $0x510] sm:$0xff] }
  0x45   :  { %v776_v22 = vpack.c.bf16 %v342_v20, %v340_v19  ;;  %v794_v51 = vpack.c.bf16 %v357_v48, %v355_v47  ;;  %v359_v53 = vld [vmem:[#allocation2 + $0x500] sm:$0xff]  ;;  %v368_v61 = vld [vmem:[#allocation2 + $0x548] sm:$0xff]  ;;  %v374_v4 = vld [vmem:[#allocation2 + $0x578] sm:$0xff] }
  0x46   :  { %687 = vmatpush1.bf16.msra.mxu0 %v686_v63  ;;  %739 = vmatpush1.bf16.msra.mxu1 %v738_v29  ;;  %v238_v63 = vld [vmem:[#allocation2 + $0x3e0] sm:$0xff]  ;;  %v798_v57 = vpack.c.bf16 %v361_v54, %v359_v53  ;;  %v373_v8 = vld [vmem:[#allocation2 + $0x570] sm:$0xff] }
  0x47   :  { %689 = vmatprep.subr.bf16.mxu0 %v688_v2  ;;  %741 = vmatprep.subr.bf16.mxu1 %v740_v30  ;;  %v762_v1 = vpack.c.bf16 %v240_v0, %v238_v63  ;;  %v328_v2 = vld [vmem:[#allocation2 + $0x408] sm:$0xff]  ;;  %v343_v29 = vld [vmem:[#allocation2 + $0x480] sm:$0xff]  ;;  %v345_v30 = vld [vmem:[#allocation2 + $0x490] sm:$0xff] }
  0x48   :  { %v764_v5 = vpack.c.bf16 %v330_v3, %v328_v2  ;;  %v369_v2 = vld [vmem:[#allocation2 + $0x550] sm:$0xff]  ;;  %v372_v3 = vld [vmem:[#allocation2 + $0x568] sm:$0xff]  ;;  %v371_v7 = vld [vmem:[#allocation2 + $0x560] sm:$0xff] }
  0x49   :  { %v808_v6 = vpack.c.bf16 %v374_v4, %v372_v3  ;;  %v379_v19 = vld [vmem:[#allocation2 + $0x5a0] sm:$0xff]  ;;  %v381_v20 = vld [vmem:[#allocation2 + $0x5b0] sm:$0xff]  ;;  %v493_v4 = vld [vmem:[#allocation2 + $0x688] sm:$0xff] }
  0x4a   :  { %691 = vmatpush1.bf16.msra.mxu0 %v690_v11  ;;  %743 = vmatpush1.bf16.msra.mxu1 %v742_v36  ;;  %v331_v11 = vld [vmem:[#allocation2 + $0x420] sm:$0xff]  ;;  %v349_v36 = vld [vmem:[#allocation2 + $0x4b0] sm:$0xff] }
  0x4b   :  { %693 = vmatprep.subr.bf16.mxu0 %v692_v14  ;;  %745 = vmatprep.subr.bf16.mxu1 %v744_v37  ;;  %v338_v14 = vld [vmem:[#allocation2 + $0x458] sm:$0xff]  ;;  %v770_v15 = vpack.c.bf16 %v333_v12, %v331_v11  ;;  %v352_v37 = vld [vmem:[#allocation2 + $0x4c8] sm:$0xff]  ;;  %v786_v39 = vpack.c.bf16 %v349_v36, %v347_v35  ;;  %v810_v11 = vpack.c.bf16 %v373_v8, %v371_v7  ;;  %v387_v42 = vld [vmem:[#allocation2 + $0x5e0] sm:$0xff] }
  0x4c   :  { %v772_v16 = vpack.c.bf16 %v338_v14, %v336_v13  ;;  %v375_v13 = vld [vmem:[#allocation2 + $0x580] sm:$0xff]  ;;  %v377_v14 = vld [vmem:[#allocation2 + $0x590] sm:$0xff] }
  0x4d   :  { %v814_v17 = vpack.c.bf16 %v377_v14, %v375_v13  ;;  %v94_v31 = vld [vmem:[%s996_s2] ss:$8 sm:$0x3]  ;;  %v476_v47 = vld [vmem:[#allocation2 + $0x600] sm:$0xff] }
  0x4e   :  { %695 = vmatpush1.bf16.msra.mxu0 %v694_v23  ;;  %747 = vmatpush1.bf16.msra.mxu1 %v746_v43  ;;  %v339_v23 = vld [vmem:[#allocation2 + $0x460] sm:$0xff]  ;;  %v356_v43 = vld [vmem:[#allocation2 + $0x4e8] sm:$0xff]  ;;  %v490_v3 = vld [vmem:[#allocation2 + $0x670] sm:$0xff] }
  0x4f   :  { %697 = vmatprep.subr.bf16.mxu0 %v696_v26  ;;  %749 = vmatprep.subr.bf16.mxu1 %v748_v44  ;;  %v346_v26 = vld [vmem:[#allocation2 + $0x498] sm:$0xff]  ;;  %v778_v27 = vpack.c.bf16 %v341_v24, %v339_v23  ;;  %v818_v23 = vpack.c.bf16 %v381_v20, %v379_v19  ;;  %v480_v54 = vld [vmem:[#allocation2 + $0x620] sm:$0xff] }
  0x50   :  { %v780_v28 = vpack.c.bf16 %v346_v26, %v344_v25  ;;  %v358_v44 = vld [vmem:[#allocation2 + $0x4f8] sm:$0xff]  ;;  %v383_v25 = vld [vmem:[#allocation2 + $0x5c0] sm:$0xff]  ;;  %v385_v26 = vld [vmem:[#allocation2 + $0x5d0] sm:$0xff] }
  0x51   :  { %v792_v46 = vpack.c.bf16 %v358_v44, %v356_v43  ;;  %v389_v43 = vld [vmem:[#allocation2 + $0x5f0] sm:$0xff]  ;;  %v492_v8 = vld [vmem:[#allocation2 + $0x680] sm:$0xff] }
  0x52   :  { %699 = vmatpush1.bf16.msra.mxu0 %v698_v33  ;;  %751 = vmatpush1.bf16.msra.mxu1 %v750_v49  ;;  %v782_v33 = vpack.c.bf16 %v345_v30, %v343_v29  ;;  %v360_v49 = vld [vmem:[#allocation2 + $0x508] sm:$0xff]  ;;  %v826_v44 = vpack.c.bf16 %v389_v43, %v387_v42  ;;  %v496_v14 = vld [vmem:[#allocation2 + $0x6a0] sm:$0xff]  ;;  %v519_v43 = vld [vmem:[#allocation2 + $0x758] sm:$0xff] }
  0x53   :  { %753 = vmatprep.subr.bf16.mxu1 %v752_v50  ;;  %765 = vmatprep.subr.bf16.mxu0 %v764_v5  ;;  %v362_v50 = vld [vmem:[#allocation2 + $0x518] sm:$0xff]  ;;  %v500_v20 = vld [vmem:[#allocation2 + $0x6c0] sm:$0xff]  ;;  %v517_v42 = vld [vmem:[#allocation2 + $0x748] sm:$0xff] }
  0x54   :  { %v796_v52 = vpack.c.bf16 %v362_v50, %v360_v49  ;;  %v478_v49 = vld [vmem:[#allocation2 + $0x610] sm:$0xff]  ;;  %v481_v50 = vld [vmem:[#allocation2 + $0x628] sm:$0xff] }
  0x55   :  { %171 = vmatmul.mubr.f32.vlgmr.msra.gmra.mrb[0].mxu0 %v28_v40  ;;  %v788_v40 = vpack.c.bf16 %v354_v38, %v352_v37 }
  0x56   :  { %755 = vmatpush1.bf16.msra.mxu1 %v754_v55  ;;  %767 = vmatpush1.bf16.msra.mxu0 %v766_v9  ;;  %v364_v55 = vld [vmem:[#allocation2 + $0x528] sm:$0xff] }
  0x57   :  { %757 = vmatprep.subr.bf16.mxu1 %v756_v56  ;;  %769 = vmatprep.subr.bf16.mxu0 %v768_v10  ;;  %v366_v56 = vld [vmem:[#allocation2 + $0x538] sm:$0xff]  ;;  %v376_v9 = vld [vmem:[#allocation2 + $0x588] sm:$0xff] }
  0x58   :  { %v800_v58 = vpack.c.bf16 %v366_v56, %v364_v55  ;;  %v378_v10 = vld [vmem:[#allocation2 + $0x598] sm:$0xff]  ;;  %v482_v55 = vld [vmem:[#allocation2 + $0x630] sm:$0xff]  ;;  %v485_v56 = vld [vmem:[#allocation2 + $0x648] sm:$0xff] }
  0x59   :  { %v812_v12 = vpack.c.bf16 %v378_v10, %v376_v9  ;;  %v494_v9 = vld [vmem:[#allocation2 + $0x690] sm:$0xff]  ;;  %v497_v10 = vld [vmem:[#allocation2 + $0x6a8] sm:$0xff] }
  0x5a   :  { %759 = vmatpush1.bf16.msra.mxu1 %v758_v59  ;;  %771 = vmatpush1.bf16.msra.mxu0 %v770_v15  ;;  %v363_v59 = vld [vmem:[#allocation2 + $0x520] sm:$0xff]  ;;  %v380_v15 = vld [vmem:[#allocation2 + $0x5a8] sm:$0xff] }
  0x5b   :  { %761 = vmatprep.subr.bf16.mxu1 %v760_v62  ;;  %773 = vmatprep.subr.bf16.mxu0 %v772_v16  ;;  %v370_v62 = vld [vmem:[#allocation2 + $0x558] sm:$0xff]  ;;  %v802_v63 = vpack.c.bf16 %v365_v60, %v363_v59  ;;  %v484_v60 = vld [vmem:[#allocation2 + $0x640] sm:$0xff] }
  0x5c   :  { %v804_v0 = vpack.c.bf16 %v370_v62, %v368_v61  ;;  %v382_v16 = vld [vmem:[#allocation2 + $0x5b8] sm:$0xff]  ;;  %v486_v61 = vld [vmem:[#allocation2 + $0x650] sm:$0xff]  ;;  %v489_v62 = vld [vmem:[#allocation2 + $0x668] sm:$0xff] }
  0x5d   :  { %v816_v18 = vpack.c.bf16 %v382_v16, %v380_v15  ;;  %v498_v15 = vld [vmem:[#allocation2 + $0x6b0] sm:$0xff]  ;;  %v501_v16 = vld [vmem:[#allocation2 + $0x6c8] sm:$0xff] }
  0x5e   :  { %763 = vmatpush1.bf16.msra.mxu1 %v762_v1  ;;  %775 = vmatpush1.bf16.msra.mxu0 %v774_v21  ;;  %v367_v1 = vld [vmem:[#allocation2 + $0x540] sm:$0xff]  ;;  %v384_v21 = vld [vmem:[#allocation2 + $0x5c8] sm:$0xff] }
  0x5f   :  { %777 = vmatprep.subr.bf16.mxu0 %v776_v22  ;;  %v806_v5 = vpack.c.bf16 %v369_v2, %v367_v1  ;;  %v386_v22 = vld [vmem:[#allocation2 + $0x5d8] sm:$0xff]  ;;  %v488_v2 = vld [vmem:[#allocation2 + $0x660] sm:$0xff] }
  0x60   :  { %v820_v24 = vpack.c.bf16 %v386_v22, %v384_v21  ;;  %v502_v21 = vld [vmem:[#allocation2 + $0x6d0] sm:$0xff]  ;;  %v505_v22 = vld [vmem:[#allocation2 + $0x6e8] sm:$0xff] }
  0x62   :  { %779 = vmatpush1.bf16.msra.mxu0 %v778_v27  ;;  %v822_v27 = vpack.c.bf16 %v385_v26, %v383_v25  ;;  %v504_v26 = vld [vmem:[#allocation2 + $0x6e0] sm:$0xff] }
  0x63   :  { %781 = vmatprep.subr.bf16.mxu0 %v780_v28  ;;  %v96_v28 = vlaneseq }
  0x65   :  { %v97_v29 = vshrl.u32 %v96_v28, 7  ;;  %v509_v28 = vld [vmem:[#allocation2 + $0x708] sm:$0xff] }
  0x66   :  { %783 = vmatpush1.bf16.msra.mxu0 %v782_v33 }
  0x67   :  { %785 = vmatprep.subr.bf16.mxu0 %v784_v34  ;;  %v964_v30 = vsub.s32 1, %v97_v29  ;;  %v969_v32 = vsub.s32 0, %v97_v29  ;;  %v511_v29 = vld [vmem:[#allocation2 + $0x718] sm:$0xff] }
  0x69   :  { %v103_v33 = vrot.slane %v94_v31, %v964_v30  ;;  %v99_v34 = vrot.slane %v94_v31, %v969_v32 }
  0x6a   :  { %787 = vmatpush1.bf16.msra.mxu0 %v786_v39  ;;  %v388_v39 = vld [vmem:[#allocation2 + $0x5e8] sm:$0xff] }
  0x6b   :  { %789 = vmatprep.subr.bf16.mxu0 %v788_v40  ;;  %v390_v40 = vld [vmem:[#allocation2 + $0x5f8] sm:$0xff] }
  0x6c   :  { %v824_v41 = vpack.c.bf16 %v390_v40, %v388_v39  ;;  %v512_v40 = vld [vmem:[#allocation2 + $0x720] sm:$0xff] }
  0x6e   :  { %791 = vmatpush1.bf16.msra.mxu0 %v790_v45  ;;  %v477_v45 = vld [vmem:[#allocation2 + $0x608] sm:$0xff] }
  0x6f   :  { %793 = vmatprep.subr.bf16.mxu0 %v792_v46  ;;  %v479_v46 = vld [vmem:[#allocation2 + $0x618] sm:$0xff] }
  0x70   :  { %v828_v48 = vpack.c.bf16 %v479_v46, %v477_v45  ;;  %v868_v45 = vpack.c.bf16 %v519_v43, %v517_v42  ;;  %v516_v46 = vld [vmem:[#allocation2 + $0x740] sm:$0xff] }
  0x72   :  { %795 = vmatpush1.bf16.msra.mxu0 %v794_v51  ;;  %v483_v51 = vld [vmem:[#allocation2 + $0x638] sm:$0xff]  ;;  %829 = vmatprep.subr.bf16.mxu1 %v828_v48  ;;  %v521_v48 = vld [vmem:[#allocation2 + $0x768] sm:$0xff] }
  0x73   :  { %797 = vmatprep.subr.bf16.mxu0 %v796_v52  ;;  %v830_v52 = vpack.c.bf16 %v478_v49, %v476_v47  ;;  %v832_v53 = vpack.c.bf16 %v483_v51, %v481_v50  ;;  %v518_v47 = vld [vmem:[#allocation2 + $0x750] sm:$0xff]  ;;  %v523_v49 = vld [vmem:[#allocation2 + $0x778] sm:$0xff] }
  0x74   :  { %v870_v50 = vpack.c.bf16 %v518_v47, %v516_v46  ;;  %v872_v51 = vpack.c.bf16 %v523_v49, %v521_v48 }
  0x76   :  { %799 = vmatpush1.bf16.msra.mxu0 %v798_v57  ;;  %v487_v57 = vld [vmem:[#allocation2 + $0x658] sm:$0xff] }
  0x77   :  { %801 = vmatprep.subr.bf16.mxu0 %v800_v58  ;;  %v834_v58 = vpack.c.bf16 %v482_v55, %v480_v54  ;;  %v836_v59 = vpack.c.bf16 %v487_v57, %v485_v56  ;;  %v525_v54 = vld [vmem:[#allocation2 + $0x788] sm:$0xff]  ;;  %v527_v55 = vld [vmem:[#allocation2 + $0x798] sm:$0xff] }
  0x78   :  { %v876_v57 = vpack.c.bf16 %v527_v55, %v525_v54 }
  0x7a   :  { %803 = vmatpush1.bf16.msra.mxu0 %v802_v63  ;;  %v491_v63 = vld [vmem:[#allocation2 + $0x678] sm:$0xff] }
  0x7b   :  { %805 = vmatprep.subr.bf16.mxu0 %v804_v0  ;;  %v838_v0 = vpack.c.bf16 %v486_v61, %v484_v60  ;;  %v840_v1 = vpack.c.bf16 %v491_v63, %v489_v62  ;;  %v529_v60 = vld [vmem:[#allocation2 + $0x7a8] sm:$0xff]  ;;  %v531_v61 = vld [vmem:[#allocation2 + $0x7b8] sm:$0xff] }
  0x7c   :  { %v880_v63 = vpack.c.bf16 %v531_v61, %v529_v60 }
  0x7e   :  { %807 = vmatpush1.bf16.msra.mxu0 %v806_v5  ;;  %v495_v5 = vld [vmem:[#allocation2 + $0x698] sm:$0xff] }
  0x7f   :  { %809 = vmatprep.subr.bf16.mxu0 %v808_v6  ;;  %v842_v6 = vpack.c.bf16 %v490_v3, %v488_v2  ;;  %v844_v7 = vpack.c.bf16 %v495_v5, %v493_v4  ;;  %v533_v2 = vld [vmem:[#allocation2 + $0x7c8] sm:$0xff]  ;;  %v535_v3 = vld [vmem:[#allocation2 + $0x7d8] sm:$0xff] }
  0x80   :  { %v884_v5 = vpack.c.bf16 %v535_v3, %v533_v2 }
  0x82   :  { %811 = vmatpush1.bf16.msra.mxu0 %v810_v11  ;;  %v499_v11 = vld [vmem:[#allocation2 + $0x6b8] sm:$0xff] }
  0x83   :  { %813 = vmatprep.subr.bf16.mxu0 %v812_v12  ;;  %v846_v12 = vpack.c.bf16 %v494_v9, %v492_v8  ;;  %v848_v13 = vpack.c.bf16 %v499_v11, %v497_v10  ;;  %v633_v9 = vld [vmem:[%s996_s2 + $0x1] ss:$8 sm:$0x3] }
  0x84   :  { %v252_v10 = vrot.slane %v633_v9, %v964_v30  ;;  %v248_v11 = vrot.slane %v633_v9, %v969_v32 }
  0x86   :  { %815 = vmatpush1.bf16.msra.mxu0 %v814_v17  ;;  %v503_v17 = vld [vmem:[#allocation2 + $0x6d8] sm:$0xff] }
  0x87   :  { %817 = vmatprep.subr.bf16.mxu0 %v816_v18  ;;  %v850_v18 = vpack.c.bf16 %v498_v15, %v496_v14  ;;  %v852_v19 = vpack.c.bf16 %v503_v17, %v501_v16  ;;  %v537_v16 = vld [vmem:[#allocation2 + $0x7e8] sm:$0xff]  ;;  %v539_v17 = vld [vmem:[#allocation2 + $0x7f8] sm:$0xff] }
  0x8a   :  { %819 = vmatpush1.bf16.msra.mxu0 %v818_v23  ;;  %v507_v23 = vld [vmem:[#allocation2 + $0x6f8] sm:$0xff] }
  0x8b   :  { %821 = vmatprep.subr.bf16.mxu0 %v820_v24  ;;  %v854_v24 = vpack.c.bf16 %v502_v21, %v500_v20  ;;  %v856_v25 = vpack.c.bf16 %v507_v23, %v505_v22  ;;  %v538_v20 = vld [vmem:[#allocation2 + $0x7f0] sm:$0xff] }
  0x8c   :  { %v634_v22 = vld [vmem:[%s996_s2 + $0x2] ss:$8 sm:$0x3] }
  0x8d   :  { %v401_v23 = vrot.slane %v634_v22, %v964_v30 }
  0x8e   :  { %823 = vmatpush1.bf16.msra.mxu0 %v822_v27  ;;  %v506_v27 = vld [vmem:[#allocation2 + $0x6f0] sm:$0xff] }
  0x8f   :  { %825 = vmatprep.subr.bf16.mxu0 %v824_v41  ;;  %v858_v31 = vpack.c.bf16 %v506_v27, %v504_v26  ;;  %v514_v41 = vld [vmem:[#allocation2 + $0x730] sm:$0xff] }
  0x92   :  { %827 = vmatpush1.bf16.msra.mxu0 %v826_v44  ;;  %v866_v44 = vpack.c.bf16 %v514_v41, %v512_v40 }
 0x128   :  { %v172_v35 = vpop.f32.mrb[0].mxu0 }
 0x129   :  { %v174_v36 = vpop.f32.mrb[1].mxu0  ;;  %v173_v38 = vadd.f32 %v172_v35, %v99_v34  ;;  %v508_v34 = vld [vmem:[#allocation2 + $0x700] sm:$0xff]  ;;  %v510_v35 = vld [vmem:[#allocation2 + $0x710] sm:$0xff] }
 0x12a   :  { %v175_v37 = vadd.f32 %v174_v36, %v103_v33  ;;  %v860_v33 = vpack.c.bf16 %v511_v29, %v509_v28  ;;  %v513_v36 = vld [vmem:[#allocation2 + $0x728] sm:$0xff]  ;;  %v635_v29 = vld [vmem:[%s996_s2 + $0x3] ss:$8 sm:$0x3] }
 0x12c   :  { %319 = vmatprep.mubr.f32.mxu1 %v175_v37  ;;  %v515_v37 = vld [vmem:[#allocation2 + $0x738] sm:$0xff] }
 0x12d   :  { %320 = vmatmul.mubr.f32.vlgmr.msra.gmra.mrb[0].mxu1 %v173_v38  ;;  %v862_v38 = vpack.c.bf16 %v510_v35, %v508_v34  ;;  %v864_v39 = vpack.c.bf16 %v515_v37, %v513_v36 }
 0x12e   :  { %831 = vmatpush1.bf16.msra.mxu1 %v830_v52  ;;  %v520_v52 = vld [vmem:[#allocation2 + $0x760] sm:$0xff] }
 0x12f   :  { %833 = vmatprep.subr.bf16.mxu1 %v832_v53  ;;  %v522_v53 = vld [vmem:[#allocation2 + $0x770] sm:$0xff] }
 0x130   :  { %v874_v56 = vpack.c.bf16 %v522_v53, %v520_v52 }
 0x132   :  { %835 = vmatpush1.bf16.msra.mxu1 %v834_v58  ;;  %v524_v58 = vld [vmem:[#allocation2 + $0x780] sm:$0xff] }
 0x133   :  { %837 = vmatprep.subr.bf16.mxu1 %v836_v59  ;;  %v526_v59 = vld [vmem:[#allocation2 + $0x790] sm:$0xff] }
 0x134   :  { %v878_v62 = vpack.c.bf16 %v526_v59, %v524_v58 }
 0x136   :  { %839 = vmatpush1.bf16.msra.mxu1 %v838_v0  ;;  %v528_v0 = vld [vmem:[#allocation2 + $0x7a0] sm:$0xff] }
 0x137   :  { %841 = vmatprep.subr.bf16.mxu1 %v840_v1  ;;  %v530_v1 = vld [vmem:[#allocation2 + $0x7b0] sm:$0xff] }
 0x138   :  { %v882_v4 = vpack.c.bf16 %v530_v1, %v528_v0 }
 0x13a   :  { %843 = vmatpush1.bf16.msra.mxu1 %v842_v6  ;;  %v532_v6 = vld [vmem:[#allocation2 + $0x7c0] sm:$0xff] }
 0x13b   :  { %845 = vmatprep.subr.bf16.mxu1 %v844_v7  ;;  %v534_v7 = vld [vmem:[#allocation2 + $0x7d0] sm:$0xff] }
 0x13c   :  { %v886_v8 = vpack.c.bf16 %v534_v7, %v532_v6 }
 0x13e   :  { %847 = vmatpush1.bf16.msra.mxu1 %v846_v12 }
 0x13f   :  { %849 = vmatprep.subr.bf16.mxu1 %v848_v13 }
 0x142   :  { %851 = vmatpush1.bf16.msra.mxu1 %v850_v18  ;;  %v888_v18 = vpack.c.bf16 %v539_v17, %v537_v16 }
 0x143   :  { %853 = vmatprep.subr.bf16.mxu1 %v852_v19  ;;  %v536_v19 = vld [vmem:[#allocation2 + $0x7e0] sm:$0xff] }
 0x144   :  { %v890_v21 = vpack.c.bf16 %v538_v20, %v536_v19 }
 0x146   :  { %855 = vmatpush1.bf16.msra.mxu1 %v854_v24  ;;  %v397_v24 = vrot.slane %v634_v22, %v969_v32 }
 0x147   :  { %857 = vmatprep.subr.bf16.mxu1 %v856_v25 }
 0x14a   :  { %859 = vmatpush1.bf16.msra.mxu1 %v858_v31  ;;  %v546_v31 = vrot.slane %v635_v29, %v969_v32 }
 0x14b   :  { %861 = vmatprep.subr.bf16.mxu1 %v860_v33  ;;  %v550_v33 = vrot.slane %v635_v29, %v964_v30 }
 0x14e   :  { %863 = vmatpush1.bf16.msra.mxu1 %v862_v38 }
 0x14f   :  { %865 = vmatprep.subr.bf16.mxu1 %v864_v39 }
 0x152   :  { %867 = vmatpush1.bf16.msra.mxu1 %v866_v44 }
 0x153   :  { %869 = vmatprep.subr.bf16.mxu1 %v868_v45 }
 0x156   :  { %871 = vmatpush1.bf16.msra.mxu1 %v870_v50 }
 0x157   :  { %873 = vmatprep.subr.bf16.mxu1 %v872_v51 }
 0x15a   :  { %875 = vmatpush1.bf16.msra.mxu1 %v874_v56 }
 0x15b   :  { %877 = vmatprep.subr.bf16.mxu1 %v876_v57 }
 0x15e   :  { %879 = vmatpush1.bf16.msra.mxu1 %v878_v62 }
 0x15f   :  { %881 = vmatprep.subr.bf16.mxu1 %v880_v63 }
 0x162   :  { %883 = vmatpush1.bf16.msra.mxu1 %v882_v4 }
 0x163   :  { %885 = vmatprep.subr.bf16.mxu1 %v884_v5 }
 0x166   :  { %887 = vmatpush1.bf16.msra.mxu1 %v886_v8 }
 0x167   :  { %889 = vmatprep.subr.bf16.mxu1 %v888_v18 }
 0x16a   :  { %891 = vmatpush1.bf16.msra.mxu1 %v890_v21 }
 0x200   :  { %v321_v12 = vpop.f32.mrb[0].mxu1 }
 0x201   :  { %v323_v13 = vpop.f32.mrb[1].mxu1  ;;  %v322_v15 = vadd.f32 %v321_v12, %v248_v11 }
 0x202   :  { %v324_v14 = vadd.f32 %v323_v13, %v252_v10 }
 0x204   :  { %468 = vmatprep.mubr.f32.mxu0 %v324_v14 }
 0x205   :  { %469 = vmatmul.mubr.f32.vlgmr.msra.gmra.mrb[2].mxu0 %v322_v15 }
 0x2d8   :  { %v470_v25 = vpop.f32.mrb[2].mxu0 }
 0x2d9   :  { %v472_v26 = vpop.f32.mrb[3].mxu0  ;;  %v471_v28 = vadd.f32 %v470_v25, %v397_v24 }
 0x2da   :  { %v473_v27 = vadd.f32 %v472_v26, %v401_v23 }
 0x2dc   :  { %617 = vmatprep.mubr.f32.mxu1 %v473_v27 }
 0x2dd   :  { %618 = vmatmul.mubr.f32.vlgmr.msra.gmra.mrb[2].mxu1 %v471_v28 }
 0x3b0   :  { %v619_v34 = vpop.f32.mrb[2].mxu1 }
 0x3b1   :  { %v620_v35 = vadd.f32 %v619_v34, %v546_v31  ;;  %v621_v36 = vpop.f32.mrb[3].mxu1 }
 0x3b2   :  { %v622_v37 = vadd.f32 %v621_v36, %v550_v33 }
 0x3b3   :  { %895 = vtanh.f32 %v620_v35 }
 0x3b4   :  { %897 = vtanh.f32 %v622_v37 }
 0x3bd   :  { %v896_v38 = vpop.eup %895 }
 0x3be   :  { %v898_v39 = vpop.eup %897  ;;  %626 = vst [vmem:[%s997_s3] sm:$0xff] %v896_v38 }
 0x3bf   :  { %627 = vst [vmem:[%s997_s3 + $0x8] sm:$0xff] %v898_v39 }
 0x3c0   :  { %632 = vsyncpa [#allocation3], 1 }

</bundles_post_ra>
